<compile_context>
chip_gen: v7x
topology: tpu7x:2x2x1
jax: 0.10.0
libtpu: 0.0.40
codegen_flags: <defaults>
</compile_context>

<pallas_src>
import math

import jax
import jax.numpy as jnp
from jax.experimental import pallas as pl
from jax.experimental.pallas import tpu as pltpu

HIDDEN = 512


def actor_kernel(x_ref, w1_ref, w2_ref, w3_ref, w4_ref, b_ref, out_ref):
    """Fused forward: 3x (bf16 matmul + f32 bias + tanh), bf16 matmul + bias, softmax."""
    x = x_ref[...]                      # f32 [TB, state_size]
    action_size = w4_ref.shape[1]

    b1 = b_ref[0:1, :]                  # f32 [1, 512]
    b2 = b_ref[1:2, :]
    b3 = b_ref[2:3, :]
    b4 = b_ref[3:4, :action_size]       # f32 [1, action_size]

    h = jnp.tanh(
        jnp.dot(x.astype(jnp.bfloat16), w1_ref[...],
                preferred_element_type=jnp.float32) + b1)
    h = jnp.tanh(
        jnp.dot(h.astype(jnp.bfloat16), w2_ref[...],
                preferred_element_type=jnp.float32) + b2)
    h = jnp.tanh(
        jnp.dot(h.astype(jnp.bfloat16), w3_ref[...],
                preferred_element_type=jnp.float32) + b3)
    logits = (
        jnp.dot(h.astype(jnp.bfloat16), w4_ref[...],
                preferred_element_type=jnp.float32) + b4)

    # numerically-stable softmax over the last axis; divide via EUP reciprocal
    m = jnp.max(logits, axis=-1, keepdims=True)
    e = jnp.exp(logits - m)
    out_ref[...] = e * pl.reciprocal(jnp.sum(e, axis=-1, keepdims=True), approx=True)


def actor_forward(x, params):
    """Batch-tiled Pallas call; weights stay VMEM-resident across batch tiles."""
    w1, w2, w3, w4, b_packed = params
    batch, state_size = x.shape
    action_size = w4.shape[1]

    # Batch tile: fill the MXU when batch is large, single tile when small.
    TB = min(batch, 256)
    padded = pl.cdiv(batch, TB) * TB
    if padded != batch:
        x = jnp.pad(x, ((0, padded - batch), (0, 0)))
    grid = (padded // TB,)

    const = lambda i: (0, 0)            # weights/biases: same block every grid step

    out = pl.pallas_call(
        actor_kernel,
        out_shape=jax.ShapeDtypeStruct((padded, action_size), jnp.float32),
        grid=grid,
        in_specs=[
            pl.BlockSpec((TB, state_size), lambda i: (i, 0)),   # x: tiled over batch
            pl.BlockSpec(w1.shape, const),
            pl.BlockSpec(w2.shape, const),
            pl.BlockSpec(w3.shape, const),
            pl.BlockSpec(w4.shape, const),
            pl.BlockSpec(b_packed.shape, const),
        ],
        out_specs=pl.BlockSpec((TB, action_size), lambda i: (i, 0)),
        compiler_params=pltpu.CompilerParams(
            dimension_semantics=("parallel",)),   # use both TCs on v7x
    )(x, w1, w2, w3, w4, b_packed)

    return out[:batch]


def init_params(key, state_size, action_size):
    """torch.nn.Linear-style init U(-k, k), k=1/sqrt(fan_in).
    Weights stored bf16 [in, out]; biases packed into a single f32 [4, HIDDEN]."""
    def lin(k, fin, fout):
        kk = 1.0 / math.sqrt(fin)
        kw, kb = jax.random.split(k)
        w = jax.random.uniform(kw, (fin, fout), jnp.float32, -kk, kk).astype(jnp.bfloat16)
        b = jax.random.uniform(kb, (fout,), jnp.float32, -kk, kk)
        return w, b

    k1, k2, k3, k4 = jax.random.split(key, 4)
    w1, b1 = lin(k1, state_size, HIDDEN)
    w2, b2 = lin(k2, HIDDEN, HIDDEN)
    w3, b3 = lin(k3, HIDDEN, HIDDEN)
    w4, b4 = lin(k4, HIDDEN, action_size)

    b_packed = jnp.zeros((4, HIDDEN), jnp.float32)
    b_packed = b_packed.at[0].set(b1).at[1].set(b2).at[2].set(b3)
    b_packed = b_packed.at[3, :action_size].set(b4)
    return (w1, w2, w3, w4, b_packed)


def reference_forward(x, params):
    """Pure-JAX reference with the SAME bf16-weight / f32-accum recipe as the kernel."""
    w1, w2, w3, w4, b_packed = params
    action_size = w4.shape[1]
    b1 = b_packed[0:1, :]
    b2 = b_packed[1:2, :]
    b3 = b_packed[2:3, :]
    b4 = b_packed[3:4, :action_size]

    def lin(h, w, b):
        return jnp.dot(h.astype(jnp.bfloat16), w,
                       preferred_element_type=jnp.float32) + b

    h = jnp.tanh(lin(x, w1, b1))
    h = jnp.tanh(lin(h, w2, b2))
    h = jnp.tanh(lin(h, w3, b3))
    return jax.nn.softmax(lin(h, w4, b4), axis=-1)


if __name__ == "__main__":
    batch = 8
    state_size = 16
    action_size = 8

    root = jax.random.PRNGKey(0)
    kx, kp = jax.random.split(root)

    x = jax.random.normal(kx, (batch, state_size), jnp.float32)
    params = init_params(kp, state_size, action_size)

    out = actor_forward(x, params)
    out = jax.block_until_ready(out)

    ref = reference_forward(x, params)

    assert out.shape == (batch, action_size)
    # rows sum to ~1 (approx reciprocal in the epilogue -> small tolerance)
    assert jnp.allclose(jnp.sum(out, axis=-1), 1.0, atol=5e-3)
    # matches a matched-precision (bf16 weights, f32 accum) reference
    assert jnp.allclose(out, ref, atol=5e-3, rtol=2e-2)

    print("KERNEL_OK")
</pallas_src>

<mosaic_0001>
module attributes {stable_mosaic.version = 11 : i64} {
  func.func @actor_kernel(%arg0: i32, %arg1: memref<8x16xf32, #tpu.memory_space<vmem>>, %arg2: memref<16x512xbf16, #tpu.memory_space<vmem>>, %arg3: memref<512x512xbf16, #tpu.memory_space<vmem>>, %arg4: memref<512x512xbf16, #tpu.memory_space<vmem>>, %arg5: memref<512x8xbf16, #tpu.memory_space<vmem>>, %arg6: memref<4x512xf32, #tpu.memory_space<vmem>>, %arg7: memref<8x8xf32, #tpu.memory_space<vmem>>) attributes {dimension_semantics = [#tpu.dimension_semantics<parallel>], iteration_bounds = array<i64: 1>, scalar_prefetch = 0 : i64, scratch_operands = 0 : i64, tpu.core_type = #tpu.core_type<tc>, window_params = [{transform_indices = @transform_0, window_bounds = array<i64: 8, 16>}, {pipeline_mode = #tpu.pipeline_mode<synchronous>, transform_indices = @transform_1, window_bounds = array<i64: 16, 512>}, {pipeline_mode = #tpu.pipeline_mode<synchronous>, transform_indices = @transform_2, window_bounds = array<i64: 512, 512>}, {pipeline_mode = #tpu.pipeline_mode<synchronous>, transform_indices = @transform_3, window_bounds = array<i64: 512, 512>}, {pipeline_mode = #tpu.pipeline_mode<synchronous>, transform_indices = @transform_4, window_bounds = array<i64: 512, 8>}, {pipeline_mode = #tpu.pipeline_mode<synchronous>, transform_indices = @transform_5, window_bounds = array<i64: 4, 512>}, {transform_indices = @transform_6, window_bounds = array<i64: 8, 8>}]} {
    %c0 = arith.constant 0 : index
    %c0_0 = arith.constant 0 : index
    %0 = vector.load %arg1[%c0, %c0_0] : memref<8x16xf32, #tpu.memory_space<vmem>>, vector<8x16xf32>
    %c0_1 = arith.constant 0 : index
    %c0_2 = arith.constant 0 : index
    %1 = vector.load %arg6[%c0_1, %c0_2] : memref<4x512xf32, #tpu.memory_space<vmem>>, vector<1x512xf32>
    %c1 = arith.constant 1 : index
    %c0_3 = arith.constant 0 : index
    %2 = vector.load %arg6[%c1, %c0_3] : memref<4x512xf32, #tpu.memory_space<vmem>>, vector<1x512xf32>
    %c2 = arith.constant 2 : index
    %c0_4 = arith.constant 0 : index
    %3 = vector.load %arg6[%c2, %c0_4] : memref<4x512xf32, #tpu.memory_space<vmem>>, vector<1x512xf32>
    %c3 = arith.constant 3 : index
    %c0_5 = arith.constant 0 : index
    %4 = vector.load %arg6[%c3, %c0_5] : memref<4x512xf32, #tpu.memory_space<vmem>>, vector<1x8xf32>
    %5 = arith.truncf %0 : vector<8x16xf32> to vector<8x16xbf16>
    %c0_6 = arith.constant 0 : index
    %c0_7 = arith.constant 0 : index
    %6 = vector.load %arg2[%c0_6, %c0_7] : memref<16x512xbf16, #tpu.memory_space<vmem>>, vector<16x512xbf16>
    %cst = arith.constant dense<0.000000e+00> : vector<8x512xf32>
    %7 = tpu.matmul %5, %6, %cst {dimension_numbers = #tpu.dot_dimension_numbers<[1], [0], [0], [1], [0, 0, 1, 1], [], []>} : vector<8x16xbf16>, vector<16x512xbf16>, vector<8x512xf32> -> vector<8x512xf32>
    %8 = vector.broadcast %1 : vector<1x512xf32> to vector<8x512xf32>
    %9 = arith.addf %7, %8 : vector<8x512xf32>
    %10 = math.tanh %9 : vector<8x512xf32>
    %11 = arith.truncf %10 : vector<8x512xf32> to vector<8x512xbf16>
    %c0_8 = arith.constant 0 : index
    %c0_9 = arith.constant 0 : index
    %12 = vector.load %arg3[%c0_8, %c0_9] : memref<512x512xbf16, #tpu.memory_space<vmem>>, vector<512x512xbf16>
    %cst_10 = arith.constant dense<0.000000e+00> : vector<8x512xf32>
    %13 = tpu.matmul %11, %12, %cst_10 {dimension_numbers = #tpu.dot_dimension_numbers<[1], [0], [0], [1], [0, 0, 1, 1], [], []>} : vector<8x512xbf16>, vector<512x512xbf16>, vector<8x512xf32> -> vector<8x512xf32>
    %14 = vector.broadcast %2 : vector<1x512xf32> to vector<8x512xf32>
    %15 = arith.addf %13, %14 : vector<8x512xf32>
    %16 = math.tanh %15 : vector<8x512xf32>
    %17 = arith.truncf %16 : vector<8x512xf32> to vector<8x512xbf16>
    %c0_11 = arith.constant 0 : index
    %c0_12 = arith.constant 0 : index
    %18 = vector.load %arg4[%c0_11, %c0_12] : memref<512x512xbf16, #tpu.memory_space<vmem>>, vector<512x512xbf16>
    %cst_13 = arith.constant dense<0.000000e+00> : vector<8x512xf32>
    %19 = tpu.matmul %17, %18, %cst_13 {dimension_numbers = #tpu.dot_dimension_numbers<[1], [0], [0], [1], [0, 0, 1, 1], [], []>} : vector<8x512xbf16>, vector<512x512xbf16>, vector<8x512xf32> -> vector<8x512xf32>
    %20 = vector.broadcast %3 : vector<1x512xf32> to vector<8x512xf32>
    %21 = arith.addf %19, %20 : vector<8x512xf32>
    %22 = math.tanh %21 : vector<8x512xf32>
    %23 = arith.truncf %22 : vector<8x512xf32> to vector<8x512xbf16>
    %c0_14 = arith.constant 0 : index
    %c0_15 = arith.constant 0 : index
    %24 = vector.load %arg5[%c0_14, %c0_15] : memref<512x8xbf16, #tpu.memory_space<vmem>>, vector<512x8xbf16>
    %cst_16 = arith.constant dense<0.000000e+00> : vector<8x8xf32>
    %25 = tpu.matmul %23, %24, %cst_16 {dimension_numbers = #tpu.dot_dimension_numbers<[1], [0], [0], [1], [0, 0, 1, 1], [], []>} : vector<8x512xbf16>, vector<512x8xbf16>, vector<8x8xf32> -> vector<8x8xf32>
    %26 = vector.broadcast %4 : vector<1x8xf32> to vector<8x8xf32>
    %27 = arith.addf %25, %26 : vector<8x8xf32>
    %cst_17 = arith.constant dense<0xFF800000> : vector<8xf32>
    %28 = vector.multi_reduction <maximumf>, %27, %cst_17 [1] : vector<8x8xf32> to vector<8xf32>
    %29 = vector.shape_cast %28 : vector<8xf32> to vector<8x1xf32>
    %30 = vector.broadcast %29 : vector<8x1xf32> to vector<8x8xf32>
    %31 = arith.subf %27, %30 : vector<8x8xf32>
    %32 = math.exp %31 : vector<8x8xf32>
    %cst_18 = arith.constant dense<0.000000e+00> : vector<8xf32>
    %33 = vector.multi_reduction <add>, %32, %cst_18 [1] : vector<8x8xf32> to vector<8xf32>
    %34 = vector.shape_cast %33 : vector<8xf32> to vector<8x1xf32>
    %35 = tpu.reciprocal %34 {approx = true} : vector<8x1xf32> -> vector<8x1xf32>
    %36 = vector.broadcast %35 : vector<8x1xf32> to vector<8x8xf32>
    %37 = arith.mulf %32, %36 : vector<8x8xf32>
    %c0_19 = arith.constant 0 : index
    %c0_20 = arith.constant 0 : index
    %38 = vector.load %arg7[%c0_19, %c0_20] : memref<8x8xf32, #tpu.memory_space<vmem>>, vector<8x8xf32>
    tpu.vector_store %arg7[%c0_19, %c0_20], %37 {strides = array<i32>} : memref<8x8xf32, #tpu.memory_space<vmem>>, vector<8x8xf32>,
    return
  }
  func.func @transform_0(%arg0: i32) -> (i32, i32) {
    %c0_i32 = arith.constant 0 : i32
    %c0_i32_0 = arith.constant 0 : i32
    return %arg0, %c0_i32 : i32, i32
  }
  func.func @transform_1(%arg0: i32) -> (i32, i32) {
    %c0_i32 = arith.constant 0 : i32
    %c0_i32_0 = arith.constant 0 : i32
    %c0_i32_1 = arith.constant 0 : i32
    return %c0_i32, %c0_i32_0 : i32, i32
  }
  func.func @transform_2(%arg0: i32) -> (i32, i32) {
    %c0_i32 = arith.constant 0 : i32
    %c0_i32_0 = arith.constant 0 : i32
    %c0_i32_1 = arith.constant 0 : i32
    return %c0_i32, %c0_i32_0 : i32, i32
  }
  func.func @transform_3(%arg0: i32) -> (i32, i32) {
    %c0_i32 = arith.constant 0 : i32
    %c0_i32_0 = arith.constant 0 : i32
    %c0_i32_1 = arith.constant 0 : i32
    return %c0_i32, %c0_i32_0 : i32, i32
  }
  func.func @transform_4(%arg0: i32) -> (i32, i32) {
    %c0_i32 = arith.constant 0 : i32
    %c0_i32_0 = arith.constant 0 : i32
    %c0_i32_1 = arith.constant 0 : i32
    return %c0_i32, %c0_i32_0 : i32, i32
  }
  func.func @transform_5(%arg0: i32) -> (i32, i32) {
    %c0_i32 = arith.constant 0 : i32
    %c0_i32_0 = arith.constant 0 : i32
    %c0_i32_1 = arith.constant 0 : i32
    return %c0_i32, %c0_i32_0 : i32, i32
  }
  func.func @transform_6(%arg0: i32) -> (i32, i32) {
    %c0_i32 = arith.constant 0 : i32
    %c0_i32_0 = arith.constant 0 : i32
    return %arg0, %c0_i32 : i32, i32
  }
}

</mosaic_0001>

<bundles_post_ra>
// kernel: tpu_custom_call.1
= control target key start
LH: loop header
LB: loop body
LE: loop exit
PB: predicated region body
PF: predicated region fallthrough
CT: control target
= control target key end

     0   :  { %11 = vsyncpa [#allocation3], 0  ;;  %s3631_s0 = inlined_call_operand.vmem [shape: f32[8,16], index: 0, kind: input, shape index: {}]   ;;  %s3632_s1 = inlined_call_operand.vmem [shape: bf16[16,512], index: 1, kind: input, shape index: {}]   ;;  %s3633_s2 = inlined_call_operand.hbm [shape: bf16[512,512], index: 2, kind: input, shape index: {}]   ;;  %s3634_s3 = inlined_call_operand.hbm [shape: bf16[512,512], index: 3, kind: input, shape index: {}]   ;;  %s3635_s4 = inlined_call_operand.vmem [shape: bf16[512,8], index: 4, kind: input, shape index: {}]   ;;  %s3636_s5 = inlined_call_operand.vmem [shape: f32[4,512], index: 5, kind: input, shape index: {}]   ;;  %s3637_s6 = inlined_call_operand.hbm [shape: f32[8,8], index: 6, kind: output, shape index: {}]  }
   0x1   :  { %12 = vsyncpa [#allocation6], 0 }
   0x2   :  { %13 = vsyncpa [#allocation4], 0  ;;  %s3384_s21 = smov [#allocation2]   ;;  %s3312_s25 = scalar_lea.hbm %s3633_s2, 16384 }
   0x3   :  { %s23_s22 = sshll.u32 %s3384_s21, 4  ;;  %p3313_p0 = scmp.ne.s32.totalorder %s3633_s2, %s3312_s25  ;;  %s24_s22 = int_to_ptr.vmem [resolvable:$true] %s23_s22 }
   0x4   :  { %p3316_p1 = scmp.lt.u32.totalorder %s3312_s25, %s3633_s2 }
   0x6   :  { %p3318_p2 = pnand %p3316_p1, %p3313_p0 }
   0x8   :  { %3321 = shalt.err (!%p3318_p2)
}
   0x9   :  { %s3322_s30 = scalar_lea.vmem %s24_s22, 16384  ;;  %p3327_p4 = scmp.lt.s32.totalorder %s24_s22, %s24_s22 }
   0xa   :  { %p3323_p3 = scmp.ne.s32.totalorder %s24_s22, %s3322_s30  ;;  %p3328_p5 = scmp.lt.s32.totalorder %s3322_s30, %s3322_s30 }
   0xc   :  { %p3329_p6 = por %p3328_p5, %p3327_p4 }
   0xe   :  { %p3330_p7 = pnand %p3329_p6, %p3323_p3 }
  0x10   :  { %3333 = shalt.err (!%p3330_p7)
}
  0x11   :  { %s3385_s7 = smov 256   ;;  %s3386_s8 = smov 16  }
  0x12   :  { %29 = dma.hbm_to_vmem [thread:$0]  %s3633_s2, 16384, %s24_s22, [#allocation3], %s3385_s7, %s3385_s7, %s3386_s8  }
  0x13   :  { %s3387_s11 = smov [#allocation5]   ;;  %s3334_s15 = scalar_lea.hbm %s3634_s3, 16384 }
  0x14   :  { %s35_s12 = sshll.u32 %s3387_s11, 4  ;;  %p3335_p8 = scmp.ne.s32.totalorder %s3634_s3, %s3334_s15  ;;  %s36_s12 = int_to_ptr.vmem [resolvable:$true] %s35_s12 }
  0x15   :  { %p3338_p9 = scmp.lt.u32.totalorder %s3334_s15, %s3634_s3 }
  0x17   :  { %p3340_p10 = pnand %p3338_p9, %p3335_p8 }
  0x19   :  { %3343 = shalt.err (!%p3340_p10)
}
  0x1a   :  { %s3344_s20 = scalar_lea.vmem %s36_s12, 16384  ;;  %p3349_p12 = scmp.lt.s32.totalorder %s36_s12, %s36_s12 }
  0x1b   :  { %p3345_p11 = scmp.ne.s32.totalorder %s36_s12, %s3344_s20  ;;  %p3350_p13 = scmp.lt.s32.totalorder %s3344_s20, %s3344_s20 }
  0x1d   :  { %p3351_p0 = por %p3350_p13, %p3349_p12 }
  0x1f   :  { %p3352_p1 = pnand %p3351_p0, %p3345_p11 }
  0x21   :  { %3355 = shalt.err (!%p3352_p1)
}
  0x22   :  { %41 = dma.hbm_to_vmem [thread:$0]  %s3634_s3, 16384, %s36_s12, [#allocation6], %s3385_s7, %s3385_s7, %s3386_s8  }
  0x23   :  { %3378 = dma.done.wait [#allocation3], 16384  }
  0x24   :  { %3379 = vsyncadd [#allocation3], 4294950912 }
  0x25   :  { %3380 = dma.done.wait [#allocation6], 16384  }
  0x26   :  { %3381 = vsyncadd [#allocation6], 4294950912  ;;  %v3388_v0 = vmov 0   ;;  %v2862_v1 = vld [vmem:[%s3632_s1 + $0x4] ss:$16 sps:$4 sm:$0xff]   ;;  %vm106_vm0 = vcmask 130048  }
  0x27   :  { %142 = vmatprep.mubr.bf16.mxu0 %v3388_v0  ;;  %183 = vmatprep.mubr.bf16.mxu1 %v3388_v0  ;;  %v2864_v2 = vld [vmem:[%s3632_s1] ss:$16 sps:$4 sm:$0xff]   ;;  %v2865_v5 = vld [vmem:[%s3632_s1 + $0xc] ss:$16 sps:$4 sm:$0xff]   ;;  %v2867_v6 = vld [vmem:[%s3632_s1 + $0x8] ss:$16 sps:$4 sm:$0xff]  }
  0x28   :  { %v53_v3 = vld [vmem:[%s3631_s0] sm:$0xff]  ;;  %110 = vmatprep.subr.bf16.mxu0 %v2862_v1  ;;  %151 = vmatprep.subr.bf16.mxu1 %v2865_v5  ;;  %v2871_v9 = vld [vmem:[#allocation2 + $0x8] ss:$16 sps:$4 sm:$0xff]   ;;  %v2873_v10 = vld [vmem:[#allocation2 + $0xc] ss:$16 sps:$4 sm:$0xff]   ;;  %vm2462_vm1 = vcmask 64512  }
  0x29   :  { %v60_v4 = vpack.c.bf16 %v53_v3, %v53_v3  ;;  %111 = vmatpush1.bf16.msra.mxu0 %v2864_v2  ;;  %v2868_v7 = vld [vmem:[#allocation2] ss:$16 sps:$4 sm:$0xff]   ;;  %v2870_v8 = vld [vmem:[#allocation2 + $0x4] ss:$16 sps:$4 sm:$0xff]   ;;  %152 = vmatpush1.bf16.msra.mxu1 %v2867_v6  ;;  %v2879_v13 = vld [vmem:[#allocation2 + $0x2c] ss:$16 sps:$4 sm:$0xff]  }
  0x2a   :  { %989 = vmatprep.subr.bf16.mxu0 %v2870_v8  ;;  %v2876_v11 = vld [vmem:[#allocation2 + $0x24] ss:$16 sps:$4 sm:$0xff]   ;;  %1071 = vmatprep.subr.bf16.mxu1 %v2873_v10  ;;  %v2874_v12 = vld [vmem:[#allocation2 + $0x20] ss:$16 sps:$4 sm:$0xff]   ;;  %v2877_v14 = vld [vmem:[#allocation2 + $0x28] ss:$16 sps:$4 sm:$0xff]  }
  0x2b   :  { %v2882_v15 = vld [vmem:[#allocation2 + $0x44] ss:$16 sps:$4 sm:$0xff]   ;;  %v2885_v16 = vld [vmem:[#allocation2 + $0x4c] ss:$16 sps:$4 sm:$0xff]   ;;  %v2880_v17 = vld [vmem:[#allocation2 + $0x40] ss:$16 sps:$4 sm:$0xff]  }
  0x2c   :  { %2497 = vmatmul.mubr.msk.bf16.vlgmr.msra.gmra.mrb[0].mxu0 %vm106_vm0, %v60_v4  ;;  %2498 = vmatmul.mubr.msk.bf16.vlgmr.msra.gmra.mrb[0].mxu1 %vm106_vm0, %v60_v4  ;;  %v2888_v18 = vld [vmem:[#allocation2 + $0x64] ss:$16 sps:$4 sm:$0xff]   ;;  %v2883_v19 = vld [vmem:[#allocation2 + $0x48] ss:$16 sps:$4 sm:$0xff]   ;;  %v2891_v20 = vld [vmem:[#allocation2 + $0x6c] ss:$16 sps:$4 sm:$0xff]  }
  0x2d   :  { %990 = vmatpush1.bf16.msra.mxu0 %v2868_v7  ;;  %1072 = vmatpush1.bf16.msra.mxu1 %v2871_v9  ;;  %v2886_v21 = vld [vmem:[#allocation2 + $0x60] ss:$16 sps:$4 sm:$0xff]   ;;  %v2894_v22 = vld [vmem:[#allocation2 + $0x84] ss:$16 sps:$4 sm:$0xff]   ;;  %v2889_v23 = vld [vmem:[#allocation2 + $0x68] ss:$16 sps:$4 sm:$0xff]   ;;  %v66_v9 = vlaneseq }
  0x2e   :  { %991 = vmatprep.subr.bf16.mxu0 %v2876_v11  ;;  %1073 = vmatprep.subr.bf16.mxu1 %v2879_v13  ;;  %v2897_v24 = vld [vmem:[#allocation2 + $0x8c] ss:$16 sps:$4 sm:$0xff]   ;;  %v2892_v25 = vld [vmem:[#allocation2 + $0x80] ss:$16 sps:$4 sm:$0xff]   ;;  %v2900_v26 = vld [vmem:[#allocation2 + $0xa4] ss:$16 sps:$4 sm:$0xff]  }
  0x2f   :  { %v2895_v27 = vld [vmem:[#allocation2 + $0x88] ss:$16 sps:$4 sm:$0xff]   ;;  %v2903_v28 = vld [vmem:[#allocation2 + $0xac] ss:$16 sps:$4 sm:$0xff]   ;;  %v2898_v29 = vld [vmem:[#allocation2 + $0xa0] ss:$16 sps:$4 sm:$0xff]  }
  0x30   :  { %v2906_v30 = vld [vmem:[#allocation2 + $0xc4] ss:$16 sps:$4 sm:$0xff]   ;;  %v2901_v31 = vld [vmem:[#allocation2 + $0xa8] ss:$16 sps:$4 sm:$0xff]   ;;  %v2909_v32 = vld [vmem:[#allocation2 + $0xcc] ss:$16 sps:$4 sm:$0xff]  }
  0x31   :  { %992 = vmatpush1.bf16.msra.mxu0 %v2874_v12  ;;  %1074 = vmatpush1.bf16.msra.mxu1 %v2877_v14  ;;  %v2904_v33 = vld [vmem:[#allocation2 + $0xc0] ss:$16 sps:$4 sm:$0xff]   ;;  %v2912_v34 = vld [vmem:[#allocation2 + $0xe4] ss:$16 sps:$4 sm:$0xff]   ;;  %v2907_v35 = vld [vmem:[#allocation2 + $0xc8] ss:$16 sps:$4 sm:$0xff]  }
  0x32   :  { %993 = vmatprep.subr.bf16.mxu0 %v2882_v15  ;;  %1075 = vmatprep.subr.bf16.mxu1 %v2885_v16  ;;  %v2915_v36 = vld [vmem:[#allocation2 + $0xec] ss:$16 sps:$4 sm:$0xff]   ;;  %v2910_v37 = vld [vmem:[#allocation2 + $0xe0] ss:$16 sps:$4 sm:$0xff]   ;;  %v2918_v38 = vld [vmem:[#allocation2 + $0x104] ss:$16 sps:$4 sm:$0xff]  }
  0x33   :  { %v2913_v39 = vld [vmem:[#allocation2 + $0xe8] ss:$16 sps:$4 sm:$0xff]   ;;  %v2916_v40 = vld [vmem:[#allocation2 + $0x100] ss:$16 sps:$4 sm:$0xff]   ;;  %v2921_v41 = vld [vmem:[#allocation2 + $0x10c] ss:$16 sps:$4 sm:$0xff]  }
  0x34   :  { %v2919_v42 = vld [vmem:[#allocation2 + $0x108] ss:$16 sps:$4 sm:$0xff]   ;;  %v2924_v43 = vld [vmem:[#allocation2 + $0x124] ss:$16 sps:$4 sm:$0xff]   ;;  %v2927_v44 = vld [vmem:[#allocation2 + $0x12c] ss:$16 sps:$4 sm:$0xff]  }
  0x35   :  { %994 = vmatpush1.bf16.msra.mxu0 %v2880_v17  ;;  %1076 = vmatpush1.bf16.msra.mxu1 %v2883_v19  ;;  %v2922_v45 = vld [vmem:[#allocation2 + $0x120] ss:$16 sps:$4 sm:$0xff]   ;;  %v2930_v46 = vld [vmem:[#allocation2 + $0x144] ss:$16 sps:$4 sm:$0xff]   ;;  %v2925_v47 = vld [vmem:[#allocation2 + $0x128] ss:$16 sps:$4 sm:$0xff]  }
  0x36   :  { %995 = vmatprep.subr.bf16.mxu0 %v2888_v18  ;;  %1077 = vmatprep.subr.bf16.mxu1 %v2891_v20  ;;  %v2933_v48 = vld [vmem:[#allocation2 + $0x14c] ss:$16 sps:$4 sm:$0xff]   ;;  %v2928_v49 = vld [vmem:[#allocation2 + $0x140] ss:$16 sps:$4 sm:$0xff]   ;;  %v2936_v50 = vld [vmem:[#allocation2 + $0x164] ss:$16 sps:$4 sm:$0xff]  }
  0x37   :  { %v2931_v51 = vld [vmem:[#allocation2 + $0x148] ss:$16 sps:$4 sm:$0xff]   ;;  %v2939_v52 = vld [vmem:[#allocation2 + $0x16c] ss:$16 sps:$4 sm:$0xff]   ;;  %v2934_v53 = vld [vmem:[#allocation2 + $0x160] ss:$16 sps:$4 sm:$0xff]  }
  0x38   :  { %v2937_v54 = vld [vmem:[#allocation2 + $0x168] ss:$16 sps:$4 sm:$0xff]   ;;  %v2942_v55 = vld [vmem:[#allocation2 + $0x184] ss:$16 sps:$4 sm:$0xff]   ;;  %v2945_v56 = vld [vmem:[#allocation2 + $0x18c] ss:$16 sps:$4 sm:$0xff]  }
  0x39   :  { %996 = vmatpush1.bf16.msra.mxu0 %v2886_v21  ;;  %1078 = vmatpush1.bf16.msra.mxu1 %v2889_v23  ;;  %v2940_v57 = vld [vmem:[#allocation2 + $0x180] ss:$16 sps:$4 sm:$0xff]   ;;  %v2943_v58 = vld [vmem:[#allocation2 + $0x188] ss:$16 sps:$4 sm:$0xff]   ;;  %v2948_v59 = vld [vmem:[#allocation2 + $0x1a4] ss:$16 sps:$4 sm:$0xff]  }
  0x3a   :  { %997 = vmatprep.subr.bf16.mxu0 %v2894_v22  ;;  %1079 = vmatprep.subr.bf16.mxu1 %v2897_v24  ;;  %v2951_v60 = vld [vmem:[#allocation2 + $0x1ac] ss:$16 sps:$4 sm:$0xff]   ;;  %v2946_v61 = vld [vmem:[#allocation2 + $0x1a0] ss:$16 sps:$4 sm:$0xff]   ;;  %v2949_v62 = vld [vmem:[#allocation2 + $0x1a8] ss:$16 sps:$4 sm:$0xff]  }
  0x3b   :  { %v2954_v63 = vld [vmem:[#allocation2 + $0x1c4] ss:$16 sps:$4 sm:$0xff]   ;;  %v2957_v0 = vld [vmem:[#allocation2 + $0x1cc] ss:$16 sps:$4 sm:$0xff]   ;;  %v2952_v1 = vld [vmem:[#allocation2 + $0x1c0] ss:$16 sps:$4 sm:$0xff]  }
  0x3c   :  { %v2955_v2 = vld [vmem:[#allocation2 + $0x1c8] ss:$16 sps:$4 sm:$0xff]   ;;  %v2960_v3 = vld [vmem:[#allocation2 + $0x1e4] ss:$16 sps:$4 sm:$0xff]   ;;  %v2963_v4 = vld [vmem:[#allocation2 + $0x1ec] ss:$16 sps:$4 sm:$0xff]  }
  0x3d   :  { %998 = vmatpush1.bf16.msra.mxu0 %v2892_v25  ;;  %1080 = vmatpush1.bf16.msra.mxu1 %v2895_v27  ;;  %v2958_v5 = vld [vmem:[#allocation2 + $0x1e0] ss:$16 sps:$4 sm:$0xff]   ;;  %v2961_v6 = vld [vmem:[#allocation2 + $0x1e8] ss:$16 sps:$4 sm:$0xff]   ;;  %v2966_v7 = vld [vmem:[#allocation2 + $0x204] ss:$16 sps:$4 sm:$0xff]  }
  0x3e   :  { %999 = vmatprep.subr.bf16.mxu0 %v2900_v26  ;;  %1081 = vmatprep.subr.bf16.mxu1 %v2903_v28  ;;  %v2969_v8 = vld [vmem:[#allocation2 + $0x20c] ss:$16 sps:$4 sm:$0xff]   ;;  %v3464_v10 = vshrl.u32 %v66_v9, 7  ;;  %v3026_v9 = vld [vmem:[#allocation2 + $0x344] ss:$16 sps:$4 sm:$0xff]  }
  0x3f   :  { %v3472_v12 = vld [vmem:[%s3636_s5] ss:$4 sm:$0xf] }
  0x40   :  { %v3467_v11 = vsub.s32 0, %v3464_v10  ;;  %v3475_v13 = vsub.s32 1, %v3464_v10  ;;  %v3478_v14 = vsub.s32 3, %v3464_v10 }
  0x41   :  { %1000 = vmatpush1.bf16.msra.mxu0 %v2898_v29  ;;  %1082 = vmatpush1.bf16.msra.mxu1 %v2901_v31 }
  0x42   :  { %1001 = vmatprep.subr.bf16.mxu0 %v2906_v30  ;;  %1083 = vmatprep.subr.bf16.mxu1 %v2909_v32  ;;  %v69_v15 = vrot.slane %v3472_v12, %v3467_v11  ;;  %v73_v16 = vrot.slane %v3472_v12, %v3475_v13  ;;  %v81_v18 = vrot.slane %v3472_v12, %v3478_v14  ;;  %v2964_v32 = vld [vmem:[#allocation2 + $0x200] ss:$16 sps:$4 sm:$0xff]  }
  0x45   :  { %1002 = vmatpush1.bf16.msra.mxu0 %v2904_v33  ;;  %1084 = vmatpush1.bf16.msra.mxu1 %v2907_v35  ;;  %v2967_v33 = vld [vmem:[#allocation2 + $0x208] ss:$16 sps:$4 sm:$0xff]  }
  0x46   :  { %1003 = vmatprep.subr.bf16.mxu0 %v2912_v34  ;;  %1085 = vmatprep.subr.bf16.mxu1 %v2915_v36  ;;  %v2972_v36 = vld [vmem:[#allocation2 + $0x224] ss:$16 sps:$4 sm:$0xff]  }
  0x49   :  { %1004 = vmatpush1.bf16.msra.mxu0 %v2910_v37  ;;  %1086 = vmatpush1.bf16.msra.mxu1 %v2913_v39  ;;  %v2975_v37 = vld [vmem:[#allocation2 + $0x22c] ss:$16 sps:$4 sm:$0xff]   ;;  %v2970_v39 = vld [vmem:[#allocation2 + $0x220] ss:$16 sps:$4 sm:$0xff]  }
  0x4a   :  { %1005 = vmatprep.subr.bf16.mxu0 %v2918_v38  ;;  %1087 = vmatprep.subr.bf16.mxu1 %v2921_v41  ;;  %v2978_v41 = vld [vmem:[#allocation2 + $0x244] ss:$16 sps:$4 sm:$0xff]  }
  0x4d   :  { %1006 = vmatpush1.bf16.msra.mxu0 %v2916_v40  ;;  %1088 = vmatpush1.bf16.msra.mxu1 %v2919_v42  ;;  %v2973_v40 = vld [vmem:[#allocation2 + $0x228] ss:$16 sps:$4 sm:$0xff]   ;;  %v2981_v42 = vld [vmem:[#allocation2 + $0x24c] ss:$16 sps:$4 sm:$0xff]  }
  0x4e   :  { %1007 = vmatprep.subr.bf16.mxu0 %v2924_v43  ;;  %1089 = vmatprep.subr.bf16.mxu1 %v2927_v44  ;;  %v2976_v43 = vld [vmem:[#allocation2 + $0x240] ss:$16 sps:$4 sm:$0xff]   ;;  %v2979_v44 = vld [vmem:[#allocation2 + $0x248] ss:$16 sps:$4 sm:$0xff]  }
  0x51   :  { %1008 = vmatpush1.bf16.msra.mxu0 %v2922_v45  ;;  %1090 = vmatpush1.bf16.msra.mxu1 %v2925_v47  ;;  %v2984_v45 = vld [vmem:[#allocation2 + $0x264] ss:$16 sps:$4 sm:$0xff]   ;;  %v2982_v47 = vld [vmem:[#allocation2 + $0x260] ss:$16 sps:$4 sm:$0xff]  }
  0x52   :  { %1009 = vmatprep.subr.bf16.mxu0 %v2930_v46  ;;  %1091 = vmatprep.subr.bf16.mxu1 %v2933_v48  ;;  %v2987_v46 = vld [vmem:[#allocation2 + $0x26c] ss:$16 sps:$4 sm:$0xff]   ;;  %v2985_v48 = vld [vmem:[#allocation2 + $0x268] ss:$16 sps:$4 sm:$0xff]  }
  0x55   :  { %1010 = vmatpush1.bf16.msra.mxu0 %v2928_v49  ;;  %1092 = vmatpush1.bf16.msra.mxu1 %v2931_v51  ;;  %v2990_v49 = vld [vmem:[#allocation2 + $0x284] ss:$16 sps:$4 sm:$0xff]   ;;  %v2988_v51 = vld [vmem:[#allocation2 + $0x280] ss:$16 sps:$4 sm:$0xff]  }
  0x56   :  { %1011 = vmatprep.subr.bf16.mxu0 %v2936_v50  ;;  %1093 = vmatprep.subr.bf16.mxu1 %v2939_v52  ;;  %v2993_v50 = vld [vmem:[#allocation2 + $0x28c] ss:$16 sps:$4 sm:$0xff]   ;;  %v2991_v52 = vld [vmem:[#allocation2 + $0x288] ss:$16 sps:$4 sm:$0xff]  }
  0x59   :  { %1012 = vmatpush1.bf16.msra.mxu0 %v2934_v53  ;;  %1094 = vmatpush1.bf16.msra.mxu1 %v2937_v54  ;;  %v2996_v53 = vld [vmem:[#allocation2 + $0x2a4] ss:$16 sps:$4 sm:$0xff]   ;;  %v2999_v54 = vld [vmem:[#allocation2 + $0x2ac] ss:$16 sps:$4 sm:$0xff]  }
  0x5a   :  { %1013 = vmatprep.subr.bf16.mxu0 %v2942_v55  ;;  %1095 = vmatprep.subr.bf16.mxu1 %v2945_v56  ;;  %v2994_v55 = vld [vmem:[#allocation2 + $0x2a0] ss:$16 sps:$4 sm:$0xff]   ;;  %v2997_v56 = vld [vmem:[#allocation2 + $0x2a8] ss:$16 sps:$4 sm:$0xff]  }
  0x5d   :  { %1014 = vmatpush1.bf16.msra.mxu0 %v2940_v57  ;;  %1096 = vmatpush1.bf16.msra.mxu1 %v2943_v58  ;;  %v3002_v57 = vld [vmem:[#allocation2 + $0x2c4] ss:$16 sps:$4 sm:$0xff]   ;;  %v3005_v58 = vld [vmem:[#allocation2 + $0x2cc] ss:$16 sps:$4 sm:$0xff]  }
  0x5e   :  { %1015 = vmatprep.subr.bf16.mxu0 %v2948_v59  ;;  %1097 = vmatprep.subr.bf16.mxu1 %v2951_v60  ;;  %v3000_v59 = vld [vmem:[#allocation2 + $0x2c0] ss:$16 sps:$4 sm:$0xff]   ;;  %v3003_v60 = vld [vmem:[#allocation2 + $0x2c8] ss:$16 sps:$4 sm:$0xff]  }
  0x61   :  { %1016 = vmatpush1.bf16.msra.mxu0 %v2946_v61  ;;  %1098 = vmatpush1.bf16.msra.mxu1 %v2949_v62  ;;  %v3008_v61 = vld [vmem:[#allocation2 + $0x2e4] ss:$16 sps:$4 sm:$0xff]   ;;  %v3011_v62 = vld [vmem:[#allocation2 + $0x2ec] ss:$16 sps:$4 sm:$0xff]  }
  0x62   :  { %1017 = vmatprep.subr.bf16.mxu0 %v2954_v63  ;;  %1099 = vmatprep.subr.bf16.mxu1 %v2957_v0  ;;  %v3006_v63 = vld [vmem:[#allocation2 + $0x2e0] ss:$16 sps:$4 sm:$0xff]   ;;  %v3009_v0 = vld [vmem:[#allocation2 + $0x2e8] ss:$16 sps:$4 sm:$0xff]  }
  0x65   :  { %1018 = vmatpush1.bf16.msra.mxu0 %v2952_v1  ;;  %1100 = vmatpush1.bf16.msra.mxu1 %v2955_v2  ;;  %v3014_v1 = vld [vmem:[#allocation2 + $0x304] ss:$16 sps:$4 sm:$0xff]   ;;  %v3017_v2 = vld [vmem:[#allocation2 + $0x30c] ss:$16 sps:$4 sm:$0xff]  }
  0x66   :  { %1019 = vmatprep.subr.bf16.mxu0 %v2960_v3  ;;  %1101 = vmatprep.subr.bf16.mxu1 %v2963_v4  ;;  %v3012_v3 = vld [vmem:[#allocation2 + $0x300] ss:$16 sps:$4 sm:$0xff]   ;;  %v3015_v4 = vld [vmem:[#allocation2 + $0x308] ss:$16 sps:$4 sm:$0xff]  }
  0x69   :  { %1020 = vmatpush1.bf16.msra.mxu0 %v2958_v5  ;;  %1102 = vmatpush1.bf16.msra.mxu1 %v2961_v6  ;;  %v3020_v5 = vld [vmem:[#allocation2 + $0x324] ss:$16 sps:$4 sm:$0xff]   ;;  %v3023_v6 = vld [vmem:[#allocation2 + $0x32c] ss:$16 sps:$4 sm:$0xff]  }
  0x6a   :  { %1030 = vmatprep.subr.bf16.mxu0 %v2966_v7  ;;  %1112 = vmatprep.subr.bf16.mxu1 %v2969_v8  ;;  %v3018_v7 = vld [vmem:[#allocation2 + $0x320] ss:$16 sps:$4 sm:$0xff]   ;;  %v3021_v8 = vld [vmem:[#allocation2 + $0x328] ss:$16 sps:$4 sm:$0xff]  }
  0xff   :  { %v144_v17 = vpop.f32.mrb[0].mxu0  ;;  %v3486_v23 = vpop.f32.mrb[0].mxu1 }
 0x100   :  { %v145_v19 = vadd.f32 %v144_v17, %v69_v15  ;;  %v146_v20 = vpop.f32.mrb[1].mxu0  ;;  %v187_v25 = vpop.f32.mrb[1].mxu1  ;;  %v3029_v15 = vld [vmem:[#allocation2 + $0x34c] ss:$16 sps:$4 sm:$0xff]   ;;  %v3027_v17 = vld [vmem:[#allocation2 + $0x348] ss:$16 sps:$4 sm:$0xff]  }
 0x101   :  { %v147_v21 = vadd.f32 %v146_v20, %v73_v16  ;;  %v148_v22 = vpop.f32.mrb[2].mxu0  ;;  %v188_v26 = vadd.f32 %v187_v25, %v81_v18  ;;  %v189_v27 = vpop.f32.mrb[2].mxu1  ;;  %v3024_v16 = vld [vmem:[#allocation2 + $0x340] ss:$16 sps:$4 sm:$0xff]   ;;  %v3489_v18 = vsub.s32 2, %v3464_v10 }
 0x102   :  { %3284 = vtanh.f32 %v145_v19  ;;  %v149_v24 = vpop.f32.mrb[3].mxu0  ;;  %v190_v28 = vpop.f32.mrb[3].mxu1  ;;  %v3032_v19 = vld [vmem:[#allocation2 + $0x364] ss:$16 sps:$4 sm:$0xff]   ;;  %v3035_v20 = vld [vmem:[#allocation2 + $0x36c] ss:$16 sps:$4 sm:$0xff]  }
 0x103   :  { %3286 = vtanh.f32 %v147_v21  ;;  %v77_v21 = vrot.slane %v3472_v12, %v3489_v18  ;;  %v3030_v22 = vld [vmem:[#allocation2 + $0x360] ss:$16 sps:$4 sm:$0xff]   ;;  %v3033_v24 = vld [vmem:[#allocation2 + $0x368] ss:$16 sps:$4 sm:$0xff]   ;;  %v3038_v25 = vld [vmem:[#allocation2 + $0x384] ss:$16 sps:$4 sm:$0xff]  }
 0x104   :  { %3288 = vtanh.f32 %v188_v26  ;;  %v3041_v26 = vld [vmem:[#allocation2 + $0x38c] ss:$16 sps:$4 sm:$0xff]   ;;  %v3036_v10 = vld [vmem:[#allocation2 + $0x380] ss:$16 sps:$4 sm:$0xff]   ;;  %v3039_v28 = vld [vmem:[#allocation2 + $0x388] ss:$16 sps:$4 sm:$0xff]  }
 0x105   :  { %v186_v27 = vadd.f32 %v3486_v23, %v77_v21  ;;  %v3042_v12 = vld [vmem:[#allocation2 + $0x3a0] ss:$16 sps:$4 sm:$0xff]  }
 0x106   :  { %v3048_v23 = vld [vmem:[#allocation2 + $0x3c0] ss:$16 sps:$4 sm:$0xff]  }
 0x107   :  { %3290 = vtanh.f32 %v186_v27  ;;  %v3114_v21 = vld [vmem:[#allocation5 + $0x120] ss:$16 sps:$4 sm:$0xff]   ;;  %v3123_v27 = vld [vmem:[#allocation5 + $0x148] ss:$16 sps:$4 sm:$0xff]  }
 0x10c   :  { %v3285_v29 = vpop.eup %3284 }
 0x10d   :  { %v3287_v30 = vpop.eup %3286  ;;  %v196_v35 = vpack.c.bf16 %v3285_v29, %v3285_v29  ;;  %v3044_v29 = vld [vmem:[#allocation2 + $0x3a4] ss:$16 sps:$4 sm:$0xff]  }
 0x10e   :  { %v197_v31 = vpack.c.bf16 %v3287_v30, %v3287_v30  ;;  %v3289_v34 = vpop.eup %3288  ;;  %v3047_v30 = vld [vmem:[#allocation2 + $0x3ac] ss:$16 sps:$4 sm:$0xff]  }
 0x10f   :  { %v199_v38 = vpack.c.bf16 %v3289_v34, %v3289_v34  ;;  %v3051_v34 = vld [vmem:[#allocation2 + $0x3c8] ss:$16 sps:$4 sm:$0xff]  }
 0x110   :  { %1021 = vmatprep.mubr.bf16.mxu0 %v197_v31  ;;  %1103 = vmatprep.mubr.bf16.mxu1 %v197_v31  ;;  %v3045_v31 = vld [vmem:[#allocation2 + $0x3a8] ss:$16 sps:$4 sm:$0xff]  }
 0x111   :  { %1022 = vmatmul.mubr.bf16.vlgmr.msra.gmra.mrb[4].mxu0 %v196_v35  ;;  %1104 = vmatmul.mubr.bf16.vlgmr.msra.gmra.mrb[4].mxu1 %v196_v35  ;;  %v3056_v35 = vld [vmem:[#allocation2 + $0x3e4] ss:$16 sps:$4 sm:$0xff]  }
 0x112   :  { %1031 = vmatpush1.bf16.msra.mxu0 %v2964_v32  ;;  %1113 = vmatpush1.bf16.msra.mxu1 %v2967_v33  ;;  %v3050_v32 = vld [vmem:[#allocation2 + $0x3c4] ss:$16 sps:$4 sm:$0xff]   ;;  %v3053_v33 = vld [vmem:[#allocation2 + $0x3cc] ss:$16 sps:$4 sm:$0xff]  }
 0x113   :  { %1032 = vmatprep.subr.bf16.mxu0 %v2972_v36  ;;  %1114 = vmatprep.subr.bf16.mxu1 %v2975_v37  ;;  %v3059_v36 = vld [vmem:[#allocation2 + $0x3ec] ss:$16 sps:$4 sm:$0xff]   ;;  %v3054_v37 = vld [vmem:[#allocation2 + $0x3e0] ss:$16 sps:$4 sm:$0xff]  }
 0x114   :  { %1062 = vmatprep.mubr.bf16.mxu0 %v199_v38  ;;  %1144 = vmatprep.mubr.bf16.mxu1 %v199_v38  ;;  %v3057_v38 = vld [vmem:[#allocation2 + $0x3e8] ss:$16 sps:$4 sm:$0xff]  }
 0x116   :  { %1033 = vmatpush1.bf16.msra.mxu0 %v2970_v39  ;;  %1115 = vmatpush1.bf16.msra.mxu1 %v2973_v40  ;;  %v3062_v39 = vld [vmem:[#allocation5 + $0x4] ss:$16 sps:$4 sm:$0xff]   ;;  %v3065_v40 = vld [vmem:[#allocation5 + $0xc] ss:$16 sps:$4 sm:$0xff]  }
 0x117   :  { %1034 = vmatprep.subr.bf16.mxu0 %v2978_v41  ;;  %1116 = vmatprep.subr.bf16.mxu1 %v2981_v42  ;;  %v3291_v41 = vpop.eup %3290  ;;  %v3060_v42 = vld [vmem:[#allocation5] ss:$16 sps:$4 sm:$0xff]  }
 0x11a   :  { %1035 = vmatpush1.bf16.msra.mxu0 %v2976_v43  ;;  %1117 = vmatpush1.bf16.msra.mxu1 %v2979_v44  ;;  %v3063_v43 = vld [vmem:[#allocation5 + $0x8] ss:$16 sps:$4 sm:$0xff]   ;;  %v198_v44 = vpack.c.bf16 %v3291_v41, %v3291_v41  ;;  %v3152_v41 = vld [vmem:[#allocation5 + $0x1e4] ss:$16 sps:$4 sm:$0xff]  }
 0x11b   :  { %1036 = vmatprep.subr.bf16.mxu0 %v2984_v45  ;;  %1118 = vmatprep.subr.bf16.mxu1 %v2987_v46  ;;  %v3068_v45 = vld [vmem:[#allocation5 + $0x24] ss:$16 sps:$4 sm:$0xff]   ;;  %v3071_v46 = vld [vmem:[#allocation5 + $0x2c] ss:$16 sps:$4 sm:$0xff]  }
 0x11e   :  { %1037 = vmatpush1.bf16.msra.mxu0 %v2982_v47  ;;  %1119 = vmatpush1.bf16.msra.mxu1 %v2985_v48  ;;  %v3066_v47 = vld [vmem:[#allocation5 + $0x20] ss:$16 sps:$4 sm:$0xff]   ;;  %v3069_v48 = vld [vmem:[#allocation5 + $0x28] ss:$16 sps:$4 sm:$0xff]  }
 0x11f   :  { %1038 = vmatprep.subr.bf16.mxu0 %v2990_v49  ;;  %1120 = vmatprep.subr.bf16.mxu1 %v2993_v50  ;;  %v3074_v49 = vld [vmem:[#allocation5 + $0x44] ss:$16 sps:$4 sm:$0xff]   ;;  %v3077_v50 = vld [vmem:[#allocation5 + $0x4c] ss:$16 sps:$4 sm:$0xff]  }
 0x122   :  { %1039 = vmatpush1.bf16.msra.mxu0 %v2988_v51  ;;  %1121 = vmatpush1.bf16.msra.mxu1 %v2991_v52  ;;  %v3072_v51 = vld [vmem:[#allocation5 + $0x40] ss:$16 sps:$4 sm:$0xff]   ;;  %v3075_v52 = vld [vmem:[#allocation5 + $0x48] ss:$16 sps:$4 sm:$0xff]  }
 0x123   :  { %1040 = vmatprep.subr.bf16.mxu0 %v2996_v53  ;;  %1122 = vmatprep.subr.bf16.mxu1 %v2999_v54  ;;  %v3080_v53 = vld [vmem:[#allocation5 + $0x64] ss:$16 sps:$4 sm:$0xff]   ;;  %v3083_v54 = vld [vmem:[#allocation5 + $0x6c] ss:$16 sps:$4 sm:$0xff]  }
 0x126   :  { %1041 = vmatpush1.bf16.msra.mxu0 %v2994_v55  ;;  %1123 = vmatpush1.bf16.msra.mxu1 %v2997_v56  ;;  %v3078_v55 = vld [vmem:[#allocation5 + $0x60] ss:$16 sps:$4 sm:$0xff]   ;;  %v3081_v56 = vld [vmem:[#allocation5 + $0x68] ss:$16 sps:$4 sm:$0xff]  }
 0x127   :  { %1042 = vmatprep.subr.bf16.mxu0 %v3002_v57  ;;  %1124 = vmatprep.subr.bf16.mxu1 %v3005_v58  ;;  %v3086_v57 = vld [vmem:[#allocation5 + $0x84] ss:$16 sps:$4 sm:$0xff]   ;;  %v3089_v58 = vld [vmem:[#allocation5 + $0x8c] ss:$16 sps:$4 sm:$0xff]  }
 0x12a   :  { %1043 = vmatpush1.bf16.msra.mxu0 %v3000_v59  ;;  %1125 = vmatpush1.bf16.msra.mxu1 %v3003_v60  ;;  %v3084_v59 = vld [vmem:[#allocation5 + $0x80] ss:$16 sps:$4 sm:$0xff]   ;;  %v3087_v60 = vld [vmem:[#allocation5 + $0x88] ss:$16 sps:$4 sm:$0xff]  }
 0x12b   :  { %1044 = vmatprep.subr.bf16.mxu0 %v3008_v61  ;;  %1126 = vmatprep.subr.bf16.mxu1 %v3011_v62  ;;  %v3092_v61 = vld [vmem:[#allocation5 + $0xa4] ss:$16 sps:$4 sm:$0xff]   ;;  %v3095_v62 = vld [vmem:[#allocation5 + $0xac] ss:$16 sps:$4 sm:$0xff]  }
 0x12e   :  { %1045 = vmatpush1.bf16.msra.mxu0 %v3006_v63  ;;  %1127 = vmatpush1.bf16.msra.mxu1 %v3009_v0  ;;  %v3090_v63 = vld [vmem:[#allocation5 + $0xa0] ss:$16 sps:$4 sm:$0xff]   ;;  %v3093_v0 = vld [vmem:[#allocation5 + $0xa8] ss:$16 sps:$4 sm:$0xff]  }
 0x12f   :  { %1046 = vmatprep.subr.bf16.mxu0 %v3014_v1  ;;  %1128 = vmatprep.subr.bf16.mxu1 %v3017_v2  ;;  %v3098_v1 = vld [vmem:[#allocation5 + $0xc4] ss:$16 sps:$4 sm:$0xff]   ;;  %v3101_v2 = vld [vmem:[#allocation5 + $0xcc] ss:$16 sps:$4 sm:$0xff]  }
 0x132   :  { %1047 = vmatpush1.bf16.msra.mxu0 %v3012_v3  ;;  %1129 = vmatpush1.bf16.msra.mxu1 %v3015_v4  ;;  %v3096_v3 = vld [vmem:[#allocation5 + $0xc0] ss:$16 sps:$4 sm:$0xff]   ;;  %v3099_v4 = vld [vmem:[#allocation5 + $0xc8] ss:$16 sps:$4 sm:$0xff]  }
 0x133   :  { %1048 = vmatprep.subr.bf16.mxu0 %v3020_v5  ;;  %1130 = vmatprep.subr.bf16.mxu1 %v3023_v6  ;;  %v3104_v5 = vld [vmem:[#allocation5 + $0xe4] ss:$16 sps:$4 sm:$0xff]   ;;  %v3107_v6 = vld [vmem:[#allocation5 + $0xec] ss:$16 sps:$4 sm:$0xff]  }
 0x136   :  { %1049 = vmatpush1.bf16.msra.mxu0 %v3018_v7  ;;  %1131 = vmatpush1.bf16.msra.mxu1 %v3021_v8  ;;  %v3102_v7 = vld [vmem:[#allocation5 + $0xe0] ss:$16 sps:$4 sm:$0xff]   ;;  %v3105_v8 = vld [vmem:[#allocation5 + $0xe8] ss:$16 sps:$4 sm:$0xff]  }
 0x137   :  { %1050 = vmatprep.subr.bf16.mxu0 %v3026_v9  ;;  %1132 = vmatprep.subr.bf16.mxu1 %v3029_v15  ;;  %v3110_v9 = vld [vmem:[#allocation5 + $0x104] ss:$16 sps:$4 sm:$0xff]   ;;  %v3113_v15 = vld [vmem:[#allocation5 + $0x10c] ss:$16 sps:$4 sm:$0xff]  }
 0x13a   :  { %1051 = vmatpush1.bf16.msra.mxu0 %v3024_v16  ;;  %1133 = vmatpush1.bf16.msra.mxu1 %v3027_v17  ;;  %v3108_v16 = vld [vmem:[#allocation5 + $0x100] ss:$16 sps:$4 sm:$0xff]   ;;  %v3111_v17 = vld [vmem:[#allocation5 + $0x108] ss:$16 sps:$4 sm:$0xff]  }
 0x13b   :  { %1052 = vmatprep.subr.bf16.mxu0 %v3032_v19  ;;  %1134 = vmatprep.subr.bf16.mxu1 %v3035_v20  ;;  %v3116_v19 = vld [vmem:[#allocation5 + $0x124] ss:$16 sps:$4 sm:$0xff]   ;;  %v3119_v20 = vld [vmem:[#allocation5 + $0x12c] ss:$16 sps:$4 sm:$0xff]  }
 0x13e   :  { %1053 = vmatpush1.bf16.msra.mxu0 %v3030_v22  ;;  %1135 = vmatpush1.bf16.msra.mxu1 %v3033_v24  ;;  %v3117_v22 = vld [vmem:[#allocation5 + $0x128] ss:$16 sps:$4 sm:$0xff]   ;;  %v3122_v24 = vld [vmem:[#allocation5 + $0x144] ss:$16 sps:$4 sm:$0xff]  }
 0x13f   :  { %1054 = vmatprep.subr.bf16.mxu0 %v3038_v25  ;;  %1136 = vmatprep.subr.bf16.mxu1 %v3041_v26  ;;  %v3125_v25 = vld [vmem:[#allocation5 + $0x14c] ss:$16 sps:$4 sm:$0xff]   ;;  %v3120_v26 = vld [vmem:[#allocation5 + $0x140] ss:$16 sps:$4 sm:$0xff]  }
 0x142   :  { %1055 = vmatpush1.bf16.msra.mxu0 %v3036_v10  ;;  %1137 = vmatpush1.bf16.msra.mxu1 %v3039_v28  ;;  %v3128_v10 = vld [vmem:[#allocation5 + $0x164] ss:$16 sps:$4 sm:$0xff]   ;;  %v3131_v28 = vld [vmem:[#allocation5 + $0x16c] ss:$16 sps:$4 sm:$0xff]  }
 0x143   :  { %1056 = vmatprep.subr.bf16.mxu0 %v3044_v29  ;;  %1138 = vmatprep.subr.bf16.mxu1 %v3047_v30  ;;  %v3126_v29 = vld [vmem:[#allocation5 + $0x160] ss:$16 sps:$4 sm:$0xff]   ;;  %v3129_v30 = vld [vmem:[#allocation5 + $0x168] ss:$16 sps:$4 sm:$0xff]  }
 0x146   :  { %1057 = vmatpush1.bf16.msra.mxu0 %v3042_v12  ;;  %1139 = vmatpush1.bf16.msra.mxu1 %v3045_v31  ;;  %v3134_v12 = vld [vmem:[#allocation5 + $0x184] ss:$16 sps:$4 sm:$0xff]   ;;  %v3137_v31 = vld [vmem:[#allocation5 + $0x18c] ss:$16 sps:$4 sm:$0xff]  }
 0x147   :  { %1058 = vmatprep.subr.bf16.mxu0 %v3050_v32  ;;  %1140 = vmatprep.subr.bf16.mxu1 %v3053_v33  ;;  %v3132_v32 = vld [vmem:[#allocation5 + $0x180] ss:$16 sps:$4 sm:$0xff]   ;;  %v3135_v33 = vld [vmem:[#allocation5 + $0x188] ss:$16 sps:$4 sm:$0xff]  }
 0x14a   :  { %1059 = vmatpush1.bf16.msra.mxu0 %v3048_v23  ;;  %1141 = vmatpush1.bf16.msra.mxu1 %v3051_v34  ;;  %v3140_v23 = vld [vmem:[#allocation5 + $0x1a4] ss:$16 sps:$4 sm:$0xff]   ;;  %v3143_v34 = vld [vmem:[#allocation5 + $0x1ac] ss:$16 sps:$4 sm:$0xff]  }
 0x14b   :  { %1060 = vmatprep.subr.bf16.mxu0 %v3056_v35  ;;  %1142 = vmatprep.subr.bf16.mxu1 %v3059_v36  ;;  %v3138_v35 = vld [vmem:[#allocation5 + $0x1a0] ss:$16 sps:$4 sm:$0xff]   ;;  %v3141_v36 = vld [vmem:[#allocation5 + $0x1a8] ss:$16 sps:$4 sm:$0xff]  }
 0x14e   :  { %1061 = vmatpush1.bf16.msra.mxu0 %v3054_v37  ;;  %1143 = vmatpush1.bf16.msra.mxu1 %v3057_v38  ;;  %v3146_v37 = vld [vmem:[#allocation5 + $0x1c4] ss:$16 sps:$4 sm:$0xff]   ;;  %v3149_v38 = vld [vmem:[#allocation5 + $0x1cc] ss:$16 sps:$4 sm:$0xff]  }
 0x14f   :  { %1950 = vmatprep.subr.bf16.mxu0 %v3062_v39  ;;  %2032 = vmatprep.subr.bf16.mxu1 %v3065_v40  ;;  %v3144_v39 = vld [vmem:[#allocation5 + $0x1c0] ss:$16 sps:$4 sm:$0xff]   ;;  %v3147_v40 = vld [vmem:[#allocation5 + $0x1c8] ss:$16 sps:$4 sm:$0xff]  }
 0x151   :  { %1063 = vmatmul.mubr.bf16.vlgmr.msra.gmra.mrb[4].mxu0 %v198_v44  ;;  %1145 = vmatmul.mubr.bf16.vlgmr.msra.gmra.mrb[4].mxu1 %v198_v44  ;;  %v3153_v44 = vld [vmem:[#allocation5 + $0x1e8] ss:$16 sps:$4 sm:$0xff]  }
 0x152   :  { %1951 = vmatpush1.bf16.msra.mxu0 %v3060_v42  ;;  %2033 = vmatpush1.bf16.msra.mxu1 %v3063_v43  ;;  %v3155_v42 = vld [vmem:[#allocation5 + $0x1ec] ss:$16 sps:$4 sm:$0xff]   ;;  %v3150_v43 = vld [vmem:[#allocation5 + $0x1e0] ss:$16 sps:$4 sm:$0xff]  }
 0x153   :  { %1952 = vmatprep.subr.bf16.mxu0 %v3068_v45  ;;  %2034 = vmatprep.subr.bf16.mxu1 %v3071_v46  ;;  %v3158_v45 = vld [vmem:[#allocation5 + $0x204] ss:$16 sps:$4 sm:$0xff]   ;;  %v3161_v46 = vld [vmem:[#allocation5 + $0x20c] ss:$16 sps:$4 sm:$0xff]  }
 0x156   :  { %1953 = vmatpush1.bf16.msra.mxu0 %v3066_v47  ;;  %2035 = vmatpush1.bf16.msra.mxu1 %v3069_v48  ;;  %v3497_v47 = vld [vmem:[%s3636_s5 + $0x1] ss:$4 sm:$0xf] }
 0x157   :  { %1954 = vmatprep.subr.bf16.mxu0 %v3074_v49  ;;  %2036 = vmatprep.subr.bf16.mxu1 %v3077_v50  ;;  %v332_v48 = vrot.slane %v3497_v47, %v3467_v11  ;;  %v336_v49 = vrot.slane %v3497_v47, %v3475_v13  ;;  %v344_v50 = vrot.slane %v3497_v47, %v3478_v14 }
 0x15a   :  { %1955 = vmatpush1.bf16.msra.mxu0 %v3072_v51  ;;  %2037 = vmatpush1.bf16.msra.mxu1 %v3075_v52 }
 0x15b   :  { %1956 = vmatprep.subr.bf16.mxu0 %v3080_v53  ;;  %2038 = vmatprep.subr.bf16.mxu1 %v3083_v54 }
 0x15e   :  { %1957 = vmatpush1.bf16.msra.mxu0 %v3078_v55  ;;  %2039 = vmatpush1.bf16.msra.mxu1 %v3081_v56 }
 0x15f   :  { %1958 = vmatprep.subr.bf16.mxu0 %v3086_v57  ;;  %2040 = vmatprep.subr.bf16.mxu1 %v3089_v58 }
 0x162   :  { %1959 = vmatpush1.bf16.msra.mxu0 %v3084_v59  ;;  %2041 = vmatpush1.bf16.msra.mxu1 %v3087_v60 }
 0x163   :  { %1960 = vmatprep.subr.bf16.mxu0 %v3092_v61  ;;  %2042 = vmatprep.subr.bf16.mxu1 %v3095_v62 }
 0x166   :  { %1961 = vmatpush1.bf16.msra.mxu0 %v3090_v63  ;;  %2043 = vmatpush1.bf16.msra.mxu1 %v3093_v0 }
 0x167   :  { %1962 = vmatprep.subr.bf16.mxu0 %v3098_v1  ;;  %2044 = vmatprep.subr.bf16.mxu1 %v3101_v2  ;;  %v3156_v2 = vld [vmem:[#allocation5 + $0x200] ss:$16 sps:$4 sm:$0xff]  }
 0x16a   :  { %1963 = vmatpush1.bf16.msra.mxu0 %v3096_v3  ;;  %2045 = vmatpush1.bf16.msra.mxu1 %v3099_v4  ;;  %v3159_v3 = vld [vmem:[#allocation5 + $0x208] ss:$16 sps:$4 sm:$0xff]  }
 0x16b   :  { %1964 = vmatprep.subr.bf16.mxu0 %v3104_v5  ;;  %2046 = vmatprep.subr.bf16.mxu1 %v3107_v6  ;;  %v3164_v5 = vld [vmem:[#allocation5 + $0x224] ss:$16 sps:$4 sm:$0xff]   ;;  %v3167_v6 = vld [vmem:[#allocation5 + $0x22c] ss:$16 sps:$4 sm:$0xff]  }
 0x16e   :  { %1965 = vmatpush1.bf16.msra.mxu0 %v3102_v7  ;;  %2047 = vmatpush1.bf16.msra.mxu1 %v3105_v8  ;;  %v3162_v8 = vld [vmem:[#allocation5 + $0x220] ss:$16 sps:$4 sm:$0xff]  }
 0x16f   :  { %1966 = vmatprep.subr.bf16.mxu0 %v3110_v9  ;;  %2048 = vmatprep.subr.bf16.mxu1 %v3113_v15  ;;  %v3165_v9 = vld [vmem:[#allocation5 + $0x228] ss:$16 sps:$4 sm:$0xff]   ;;  %v3170_v15 = vld [vmem:[#allocation5 + $0x244] ss:$16 sps:$4 sm:$0xff]  }
 0x172   :  { %1967 = vmatpush1.bf16.msra.mxu0 %v3108_v16  ;;  %2049 = vmatpush1.bf16.msra.mxu1 %v3111_v17  ;;  %v3173_v16 = vld [vmem:[#allocation5 + $0x24c] ss:$16 sps:$4 sm:$0xff]   ;;  %v3168_v17 = vld [vmem:[#allocation5 + $0x240] ss:$16 sps:$4 sm:$0xff]  }
 0x173   :  { %1968 = vmatprep.subr.bf16.mxu0 %v3116_v19  ;;  %2050 = vmatprep.subr.bf16.mxu1 %v3119_v20  ;;  %v3171_v19 = vld [vmem:[#allocation5 + $0x248] ss:$16 sps:$4 sm:$0xff]   ;;  %v3176_v20 = vld [vmem:[#allocation5 + $0x264] ss:$16 sps:$4 sm:$0xff]  }
 0x176   :  { %1969 = vmatpush1.bf16.msra.mxu0 %v3114_v21  ;;  %2051 = vmatpush1.bf16.msra.mxu1 %v3117_v22  ;;  %v3179_v21 = vld [vmem:[#allocation5 + $0x26c] ss:$16 sps:$4 sm:$0xff]   ;;  %v3174_v22 = vld [vmem:[#allocation5 + $0x260] ss:$16 sps:$4 sm:$0xff]  }
 0x177   :  { %1970 = vmatprep.subr.bf16.mxu0 %v3122_v24  ;;  %2052 = vmatprep.subr.bf16.mxu1 %v3125_v25  ;;  %v3177_v24 = vld [vmem:[#allocation5 + $0x268] ss:$16 sps:$4 sm:$0xff]   ;;  %v3182_v25 = vld [vmem:[#allocation5 + $0x284] ss:$16 sps:$4 sm:$0xff]  }
 0x17a   :  { %1971 = vmatpush1.bf16.msra.mxu0 %v3120_v26  ;;  %2053 = vmatpush1.bf16.msra.mxu1 %v3123_v27  ;;  %v3185_v26 = vld [vmem:[#allocation5 + $0x28c] ss:$16 sps:$4 sm:$0xff]   ;;  %v3180_v27 = vld [vmem:[#allocation5 + $0x280] ss:$16 sps:$4 sm:$0xff]  }
 0x17b   :  { %1972 = vmatprep.subr.bf16.mxu0 %v3128_v10  ;;  %2054 = vmatprep.subr.bf16.mxu1 %v3131_v28  ;;  %v3183_v10 = vld [vmem:[#allocation5 + $0x288] ss:$16 sps:$4 sm:$0xff]   ;;  %v3188_v28 = vld [vmem:[#allocation5 + $0x2a4] ss:$16 sps:$4 sm:$0xff]  }
 0x17e   :  { %1973 = vmatpush1.bf16.msra.mxu0 %v3126_v29  ;;  %2055 = vmatpush1.bf16.msra.mxu1 %v3129_v30  ;;  %v3191_v29 = vld [vmem:[#allocation5 + $0x2ac] ss:$16 sps:$4 sm:$0xff]   ;;  %v3186_v30 = vld [vmem:[#allocation5 + $0x2a0] ss:$16 sps:$4 sm:$0xff]  }
 0x17f   :  { %1974 = vmatprep.subr.bf16.mxu0 %v3134_v12  ;;  %2056 = vmatprep.subr.bf16.mxu1 %v3137_v31  ;;  %v3189_v12 = vld [vmem:[#allocation5 + $0x2a8] ss:$16 sps:$4 sm:$0xff]   ;;  %v3194_v31 = vld [vmem:[#allocation5 + $0x2c4] ss:$16 sps:$4 sm:$0xff]  }
 0x182   :  { %1975 = vmatpush1.bf16.msra.mxu0 %v3132_v32  ;;  %2057 = vmatpush1.bf16.msra.mxu1 %v3135_v33  ;;  %v3197_v32 = vld [vmem:[#allocation5 + $0x2cc] ss:$16 sps:$4 sm:$0xff]   ;;  %v3192_v33 = vld [vmem:[#allocation5 + $0x2c0] ss:$16 sps:$4 sm:$0xff]  }
 0x183   :  { %1976 = vmatprep.subr.bf16.mxu0 %v3140_v23  ;;  %2058 = vmatprep.subr.bf16.mxu1 %v3143_v34  ;;  %v3195_v23 = vld [vmem:[#allocation5 + $0x2c8] ss:$16 sps:$4 sm:$0xff]   ;;  %v3200_v34 = vld [vmem:[#allocation5 + $0x2e4] ss:$16 sps:$4 sm:$0xff]  }
 0x186   :  { %1977 = vmatpush1.bf16.msra.mxu0 %v3138_v35  ;;  %2059 = vmatpush1.bf16.msra.mxu1 %v3141_v36  ;;  %v3203_v35 = vld [vmem:[#allocation5 + $0x2ec] ss:$16 sps:$4 sm:$0xff]   ;;  %v3198_v36 = vld [vmem:[#allocation5 + $0x2e0] ss:$16 sps:$4 sm:$0xff]  }
 0x187   :  { %1978 = vmatprep.subr.bf16.mxu0 %v3146_v37  ;;  %2060 = vmatprep.subr.bf16.mxu1 %v3149_v38  ;;  %v3201_v37 = vld [vmem:[#allocation5 + $0x2e8] ss:$16 sps:$4 sm:$0xff]   ;;  %v3206_v38 = vld [vmem:[#allocation5 + $0x304] ss:$16 sps:$4 sm:$0xff]  }
 0x18a   :  { %1979 = vmatpush1.bf16.msra.mxu0 %v3144_v39  ;;  %2061 = vmatpush1.bf16.msra.mxu1 %v3147_v40  ;;  %v3209_v39 = vld [vmem:[#allocation5 + $0x30c] ss:$16 sps:$4 sm:$0xff]   ;;  %v3204_v40 = vld [vmem:[#allocation5 + $0x300] ss:$16 sps:$4 sm:$0xff]  }
 0x18b   :  { %1980 = vmatprep.subr.bf16.mxu0 %v3152_v41  ;;  %2062 = vmatprep.subr.bf16.mxu1 %v3155_v42  ;;  %v3207_v41 = vld [vmem:[#allocation5 + $0x308] ss:$16 sps:$4 sm:$0xff]   ;;  %v3212_v42 = vld [vmem:[#allocation5 + $0x324] ss:$16 sps:$4 sm:$0xff]  }
 0x18e   :  { %1981 = vmatpush1.bf16.msra.mxu0 %v3150_v43  ;;  %2063 = vmatpush1.bf16.msra.mxu1 %v3153_v44  ;;  %v3215_v43 = vld [vmem:[#allocation5 + $0x32c] ss:$16 sps:$4 sm:$0xff]   ;;  %v3210_v44 = vld [vmem:[#allocation5 + $0x320] ss:$16 sps:$4 sm:$0xff]  }
 0x18f   :  { %1991 = vmatprep.subr.bf16.mxu0 %v3158_v45  ;;  %2073 = vmatprep.subr.bf16.mxu1 %v3161_v46  ;;  %v3213_v45 = vld [vmem:[#allocation5 + $0x328] ss:$16 sps:$4 sm:$0xff]   ;;  %v3218_v46 = vld [vmem:[#allocation5 + $0x344] ss:$16 sps:$4 sm:$0xff]  }
 0x224   :  { %v1064_v51 = vpop.f32.mrb[4].mxu0  ;;  %v3505_v52 = vpop.f32.mrb[4].mxu1 }
 0x225   :  { %v2832_v53 = vadd.f32 %v1064_v51, %v332_v48  ;;  %v1066_v54 = vpop.f32.mrb[5].mxu0  ;;  %v1148_v55 = vpop.f32.mrb[5].mxu1  ;;  %v3221_v48 = vld [vmem:[#allocation5 + $0x34c] ss:$16 sps:$4 sm:$0xff]   ;;  %v3224_v51 = vld [vmem:[#allocation5 + $0x364] ss:$16 sps:$4 sm:$0xff]  }
 0x226   :  { %v2833_v56 = vadd.f32 %v1066_v54, %v336_v49  ;;  %v2835_v57 = vadd.f32 %v1148_v55, %v344_v50  ;;  %v1068_v58 = vpop.f32.mrb[6].mxu0  ;;  %v1150_v59 = vpop.f32.mrb[6].mxu1  ;;  %v3216_v49 = vld [vmem:[#allocation5 + $0x340] ss:$16 sps:$4 sm:$0xff]   ;;  %v3219_v50 = vld [vmem:[#allocation5 + $0x348] ss:$16 sps:$4 sm:$0xff]   ;;  %v340_v54 = vrot.slane %v3497_v47, %v3489_v18 }
 0x227   :  { %v1069_v60 = vpop.f32.mrb[7].mxu0  ;;  %v1151_v61 = vpop.f32.mrb[7].mxu1  ;;  %3292 = vtanh.f32 %v2832_v53  ;;  %v3227_v53 = vld [vmem:[#allocation5 + $0x36c] ss:$16 sps:$4 sm:$0xff]   ;;  %v3222_v55 = vld [vmem:[#allocation5 + $0x360] ss:$16 sps:$4 sm:$0xff]  }
 0x228   :  { %3294 = vtanh.f32 %v2833_v56  ;;  %v3225_v56 = vld [vmem:[#allocation5 + $0x368] ss:$16 sps:$4 sm:$0xff]   ;;  %v3233_v58 = vld [vmem:[#allocation5 + $0x38c] ss:$16 sps:$4 sm:$0xff]   ;;  %v2834_v59 = vadd.f32 %v3505_v52, %v340_v54  ;;  %v3228_v60 = vld [vmem:[#allocation5 + $0x380] ss:$16 sps:$4 sm:$0xff]  }
 0x229   :  { %3296 = vtanh.f32 %v2835_v57  ;;  %v3230_v57 = vld [vmem:[#allocation5 + $0x384] ss:$16 sps:$4 sm:$0xff]   ;;  %v3231_v61 = vld [vmem:[#allocation5 + $0x388] ss:$16 sps:$4 sm:$0xff]   ;;  %v3234_v47 = vld [vmem:[#allocation5 + $0x3a0] ss:$16 sps:$4 sm:$0xff]  }
 0x22a   :  { %3298 = vtanh.f32 %v2834_v59  ;;  %v3240_v52 = vld [vmem:[#allocation5 + $0x3c0] ss:$16 sps:$4 sm:$0xff]  }
 0x231   :  { %v3293_v62 = vpop.eup %3292 }
 0x232   :  { %v3295_v63 = vpop.eup %3294  ;;  %v1157_v4 = vpack.c.bf16 %v3293_v62, %v3293_v62  ;;  %v3236_v62 = vld [vmem:[#allocation5 + $0x3a4] ss:$16 sps:$4 sm:$0xff]  }
 0x233   :  { %v3297_v0 = vpop.eup %3296  ;;  %v1158_v1 = vpack.c.bf16 %v3295_v63, %v3295_v63  ;;  %v3239_v63 = vld [vmem:[#allocation5 + $0x3ac] ss:$16 sps:$4 sm:$0xff]  }
 0x234   :  { %v1160_v7 = vpack.c.bf16 %v3297_v0, %v3297_v0  ;;  %v3237_v0 = vld [vmem:[#allocation5 + $0x3a8] ss:$16 sps:$4 sm:$0xff]  }
 0x235   :  { %1982 = vmatprep.mubr.bf16.mxu0 %v1158_v1  ;;  %2064 = vmatprep.mubr.bf16.mxu1 %v1158_v1  ;;  %v3242_v1 = vld [vmem:[#allocation5 + $0x3c4] ss:$16 sps:$4 sm:$0xff]  }
 0x236   :  { %1983 = vmatmul.mubr.bf16.vlgmr.msra.gmra.mrb[8].mxu0 %v1157_v4  ;;  %2065 = vmatmul.mubr.bf16.vlgmr.msra.gmra.mrb[8].mxu1 %v1157_v4  ;;  %v3248_v4 = vld [vmem:[#allocation5 + $0x3e4] ss:$16 sps:$4 sm:$0xff]  }
 0x237   :  { %1992 = vmatpush1.bf16.msra.mxu0 %v3156_v2  ;;  %2074 = vmatpush1.bf16.msra.mxu1 %v3159_v3  ;;  %v3245_v2 = vld [vmem:[#allocation5 + $0x3cc] ss:$16 sps:$4 sm:$0xff]   ;;  %v3243_v3 = vld [vmem:[#allocation5 + $0x3c8] ss:$16 sps:$4 sm:$0xff]  }
 0x238   :  { %2023 = vmatprep.mubr.bf16.mxu0 %v1160_v7  ;;  %2105 = vmatprep.mubr.bf16.mxu1 %v1160_v7  ;;  %v3249_v7 = vld [vmem:[#allocation5 + $0x3e8] ss:$16 sps:$4 sm:$0xff]  }
 0x239   :  { %1993 = vmatprep.subr.bf16.mxu0 %v3164_v5  ;;  %2075 = vmatprep.subr.bf16.mxu1 %v3167_v6  ;;  %v3251_v5 = vld [vmem:[#allocation5 + $0x3ec] ss:$16 sps:$4 sm:$0xff]   ;;  %v3246_v6 = vld [vmem:[#allocation5 + $0x3e0] ss:$16 sps:$4 sm:$0xff]  }
 0x23b   :  { %1994 = vmatpush1.bf16.msra.mxu0 %v3162_v8  ;;  %2076 = vmatpush1.bf16.msra.mxu1 %v3165_v9  ;;  %v3252_v8 = vld [vmem:[%s3635_s4 + $0x40] sm:$0xff]  }
 0x23c   :  { %1995 = vmatprep.subr.bf16.mxu0 %v3170_v15  ;;  %2077 = vmatprep.subr.bf16.mxu1 %v3173_v16  ;;  %v3253_v9 = vld [vmem:[%s3635_s4 + $0xc0] sm:$0xff]   ;;  %v3299_v15 = vpop.eup %3298 }
 0x23d   :  { %v3254_v16 = vld [vmem:[%s3635_s4] sm:$0xff]  }
 0x23f   :  { %1996 = vmatpush1.bf16.msra.mxu0 %v3168_v17  ;;  %2078 = vmatpush1.bf16.msra.mxu1 %v3171_v19  ;;  %v3255_v17 = vld [vmem:[%s3635_s4 + $0x80] sm:$0xff]   ;;  %v1159_v19 = vpack.c.bf16 %v3299_v15, %v3299_v15 }
 0x240   :  { %1997 = vmatprep.subr.bf16.mxu0 %v3176_v20  ;;  %2079 = vmatprep.subr.bf16.mxu1 %v3179_v21  ;;  %v3256_v20 = vld [vmem:[%s3635_s4 + $0x48] sm:$0xff]  }
 0x241   :  { %v3257_v21 = vld [vmem:[%s3635_s4 + $0xc8] sm:$0xff]  }
 0x243   :  { %1998 = vmatpush1.bf16.msra.mxu0 %v3174_v22  ;;  %2080 = vmatpush1.bf16.msra.mxu1 %v3177_v24  ;;  %v3258_v22 = vld [vmem:[%s3635_s4 + $0x8] sm:$0xff]  }
 0x244   :  { %1999 = vmatprep.subr.bf16.mxu0 %v3182_v25  ;;  %2081 = vmatprep.subr.bf16.mxu1 %v3185_v26  ;;  %v3259_v24 = vld [vmem:[%s3635_s4 + $0x88] sm:$0xff]   ;;  %v3260_v25 = vld [vmem:[%s3635_s4 + $0x50] sm:$0xff]  }
 0x245   :  { %v3261_v26 = vld [vmem:[%s3635_s4 + $0xd0] sm:$0xff]  }
 0x247   :  { %2000 = vmatpush1.bf16.msra.mxu0 %v3180_v27  ;;  %2082 = vmatpush1.bf16.msra.mxu1 %v3183_v10  ;;  %v3262_v27 = vld [vmem:[%s3635_s4 + $0x10] sm:$0xff]  }
 0x248   :  { %2001 = vmatprep.subr.bf16.mxu0 %v3188_v28  ;;  %2083 = vmatprep.subr.bf16.mxu1 %v3191_v29  ;;  %v3263_v10 = vld [vmem:[%s3635_s4 + $0x90] sm:$0xff]   ;;  %v3264_v28 = vld [vmem:[%s3635_s4 + $0x58] sm:$0xff]  }
 0x249   :  { %v3265_v29 = vld [vmem:[%s3635_s4 + $0xd8] sm:$0xff]  }
 0x24b   :  { %2002 = vmatpush1.bf16.msra.mxu0 %v3186_v30  ;;  %2084 = vmatpush1.bf16.msra.mxu1 %v3189_v12  ;;  %v3266_v30 = vld [vmem:[%s3635_s4 + $0x18] sm:$0xff]  }
 0x24c   :  { %2003 = vmatprep.subr.bf16.mxu0 %v3194_v31  ;;  %2085 = vmatprep.subr.bf16.mxu1 %v3197_v32  ;;  %v3267_v12 = vld [vmem:[%s3635_s4 + $0x98] sm:$0xff]   ;;  %v3268_v31 = vld [vmem:[%s3635_s4 + $0x60] sm:$0xff]  }
 0x24d   :  { %v3269_v32 = vld [vmem:[%s3635_s4 + $0xe0] sm:$0xff]  }
 0x24f   :  { %2004 = vmatpush1.bf16.msra.mxu0 %v3192_v33  ;;  %2086 = vmatpush1.bf16.msra.mxu1 %v3195_v23  ;;  %v3270_v33 = vld [vmem:[%s3635_s4 + $0x20] sm:$0xff]  }
 0x250   :  { %2005 = vmatprep.subr.bf16.mxu0 %v3200_v34  ;;  %2087 = vmatprep.subr.bf16.mxu1 %v3203_v35  ;;  %v3271_v23 = vld [vmem:[%s3635_s4 + $0xa0] sm:$0xff]   ;;  %v3272_v34 = vld [vmem:[%s3635_s4 + $0x68] sm:$0xff]  }
 0x251   :  { %v3273_v35 = vld [vmem:[%s3635_s4 + $0xe8] sm:$0xff]  }
 0x253   :  { %2006 = vmatpush1.bf16.msra.mxu0 %v3198_v36  ;;  %2088 = vmatpush1.bf16.msra.mxu1 %v3201_v37  ;;  %v3274_v36 = vld [vmem:[%s3635_s4 + $0x28] sm:$0xff]  }
 0x254   :  { %2007 = vmatprep.subr.bf16.mxu0 %v3206_v38  ;;  %2089 = vmatprep.subr.bf16.mxu1 %v3209_v39  ;;  %v3275_v37 = vld [vmem:[%s3635_s4 + $0xa8] sm:$0xff]   ;;  %v3276_v38 = vld [vmem:[%s3635_s4 + $0x70] sm:$0xff]  }
 0x255   :  { %v3277_v39 = vld [vmem:[%s3635_s4 + $0xf0] sm:$0xff]  }
 0x257   :  { %2008 = vmatpush1.bf16.msra.mxu0 %v3204_v40  ;;  %2090 = vmatpush1.bf16.msra.mxu1 %v3207_v41  ;;  %v3278_v40 = vld [vmem:[%s3635_s4 + $0x30] sm:$0xff]  }
 0x258   :  { %2009 = vmatprep.subr.bf16.mxu0 %v3212_v42  ;;  %2091 = vmatprep.subr.bf16.mxu1 %v3215_v43  ;;  %v3279_v41 = vld [vmem:[%s3635_s4 + $0xb0] sm:$0xff]   ;;  %v3280_v42 = vld [vmem:[%s3635_s4 + $0x78] sm:$0xff]  }
 0x259   :  { %v3281_v43 = vld [vmem:[%s3635_s4 + $0xf8] sm:$0xff]  }
 0x25b   :  { %2010 = vmatpush1.bf16.msra.mxu0 %v3210_v44  ;;  %2092 = vmatpush1.bf16.msra.mxu1 %v3213_v45  ;;  %v3282_v44 = vld [vmem:[%s3635_s4 + $0x38] sm:$0xff]  }
 0x25c   :  { %2011 = vmatprep.subr.bf16.mxu0 %v3218_v46  ;;  %2093 = vmatprep.subr.bf16.mxu1 %v3221_v48  ;;  %v3283_v45 = vld [vmem:[%s3635_s4 + $0xb8] sm:$0xff]   ;;  %v2492_v46 = vld [vmem:[%s3636_s5 + $0x2] ss:$4 sm:$0xf] }
 0x25d   :  { %v1293_v48 = vrot.slane %v2492_v46, %v3467_v11 }
 0x25f   :  { %2012 = vmatpush1.bf16.msra.mxu0 %v3216_v49  ;;  %2094 = vmatpush1.bf16.msra.mxu1 %v3219_v50  ;;  %v1301_v49 = vrot.slane %v2492_v46, %v3489_v18  ;;  %v1297_v50 = vrot.slane %v2492_v46, %v3475_v13 }
 0x260   :  { %2013 = vmatprep.subr.bf16.mxu0 %v3224_v51  ;;  %2095 = vmatprep.subr.bf16.mxu1 %v3227_v53  ;;  %v1305_v51 = vrot.slane %v2492_v46, %v3478_v14 }
 0x263   :  { %2014 = vmatpush1.bf16.msra.mxu0 %v3222_v55  ;;  %2096 = vmatpush1.bf16.msra.mxu1 %v3225_v56 }
 0x264   :  { %2015 = vmatprep.subr.bf16.mxu0 %v3230_v57  ;;  %2097 = vmatprep.subr.bf16.mxu1 %v3233_v58 }
 0x267   :  { %2016 = vmatpush1.bf16.msra.mxu0 %v3228_v60  ;;  %2098 = vmatpush1.bf16.msra.mxu1 %v3231_v61 }
 0x268   :  { %2017 = vmatprep.subr.bf16.mxu0 %v3236_v62  ;;  %2099 = vmatprep.subr.bf16.mxu1 %v3239_v63 }
 0x26b   :  { %2018 = vmatpush1.bf16.msra.mxu0 %v3234_v47  ;;  %2100 = vmatpush1.bf16.msra.mxu1 %v3237_v0 }
 0x26c   :  { %2019 = vmatprep.subr.bf16.mxu0 %v3242_v1  ;;  %2101 = vmatprep.subr.bf16.mxu1 %v3245_v2 }
 0x26f   :  { %2020 = vmatpush1.bf16.msra.mxu0 %v3240_v52  ;;  %2102 = vmatpush1.bf16.msra.mxu1 %v3243_v3 }
 0x270   :  { %2021 = vmatprep.subr.bf16.mxu0 %v3248_v4  ;;  %2103 = vmatprep.subr.bf16.mxu1 %v3251_v5  ;;  %v2755_v5 = vld [vmem:[%s3636_s5 + $0x3] ss:$0 sm:$0xff]  ;;  %s3389_s5 = smov [#allocation7]  }
 0x271   :  { %s2481_s20 = sshll.u32 %s3389_s5, 4  ;;  %s2482_s20 = int_to_ptr.vmem [resolvable:$true] %s2481_s20 }
 0x272   :  { %s3356_s2 = scalar_lea.vmem %s2482_s20, 128  ;;  %p3361_p3 = scmp.lt.s32.totalorder %s2482_s20, %s2482_s20 }
 0x273   :  { %2022 = vmatpush1.bf16.msra.mxu0 %v3246_v6  ;;  %2104 = vmatpush1.bf16.msra.mxu1 %v3249_v7  ;;  %p3357_p2 = scmp.ne.s32.totalorder %s2482_s20, %s3356_s2  ;;  %p3362_p4 = scmp.lt.s32.totalorder %s3356_s2, %s3356_s2 }
 0x274   :  { %2788 = vmatprep.subr.bf16.mxu0 %v3252_v8  ;;  %2810 = vmatprep.subr.bf16.mxu1 %v3253_v9 }
 0x275   :  { %p3363_p5 = por %p3362_p4, %p3361_p3 }
 0x276   :  { %2024 = vmatmul.mubr.bf16.vlgmr.msra.gmra.mrb[8].mxu0 %v1159_v19  ;;  %2106 = vmatmul.mubr.bf16.vlgmr.msra.gmra.mrb[8].mxu1 %v1159_v19 }
 0x277   :  { %2789 = vmatpush3.bf16.msra.mxu0 %v3254_v16  ;;  %2811 = vmatpush3.bf16.msra.mxu1 %v3255_v17  ;;  %p3364_p6 = pnand %p3363_p5, %p3357_p2 }
 0x278   :  { %2790 = vmatprep.subr.bf16.mxu0 %v3256_v20  ;;  %2812 = vmatprep.subr.bf16.mxu1 %v3257_v21 }
 0x27b   :  { %2791 = vmatpush3.bf16.msra.mxu0 %v3258_v22  ;;  %2813 = vmatpush3.bf16.msra.mxu1 %v3259_v24 }
 0x27c   :  { %2792 = vmatprep.subr.bf16.mxu0 %v3260_v25  ;;  %2814 = vmatprep.subr.bf16.mxu1 %v3261_v26 }
 0x27f   :  { %2793 = vmatpush3.bf16.msra.mxu0 %v3262_v27  ;;  %2815 = vmatpush3.bf16.msra.mxu1 %v3263_v10 }
 0x280   :  { %2794 = vmatprep.subr.bf16.mxu0 %v3264_v28  ;;  %2816 = vmatprep.subr.bf16.mxu1 %v3265_v29 }
 0x283   :  { %2795 = vmatpush3.bf16.msra.mxu0 %v3266_v30  ;;  %2817 = vmatpush3.bf16.msra.mxu1 %v3267_v12 }
 0x284   :  { %2796 = vmatprep.subr.bf16.mxu0 %v3268_v31  ;;  %2818 = vmatprep.subr.bf16.mxu1 %v3269_v32 }
 0x287   :  { %2797 = vmatpush3.bf16.msra.mxu0 %v3270_v33  ;;  %2819 = vmatpush3.bf16.msra.mxu1 %v3271_v23 }
 0x288   :  { %2798 = vmatprep.subr.bf16.mxu0 %v3272_v34  ;;  %2820 = vmatprep.subr.bf16.mxu1 %v3273_v35 }
 0x28b   :  { %2799 = vmatpush3.bf16.msra.mxu0 %v3274_v36  ;;  %2821 = vmatpush3.bf16.msra.mxu1 %v3275_v37 }
 0x28c   :  { %2800 = vmatprep.subr.bf16.mxu0 %v3276_v38  ;;  %2822 = vmatprep.subr.bf16.mxu1 %v3277_v39 }
 0x28f   :  { %2801 = vmatpush3.bf16.msra.mxu0 %v3278_v40  ;;  %2823 = vmatpush3.bf16.msra.mxu1 %v3279_v41 }
 0x290   :  { %2802 = vmatprep.subr.bf16.mxu0 %v3280_v42  ;;  %2824 = vmatprep.subr.bf16.mxu1 %v3281_v43 }
 0x293   :  { %2803 = vmatpush3.bf16.msra.mxu0 %v3282_v44  ;;  %2825 = vmatpush3.bf16.msra.mxu1 %v3283_v45 }
 0x349   :  { %v2025_v53 = vpop.f32.mrb[8].mxu0  ;;  %v2107_v54 = vpop.f32.mrb[8].mxu1 }
 0x34a   :  { %v2836_v55 = vadd.f32 %v2025_v53, %v1293_v48  ;;  %v2838_v56 = vadd.f32 %v2107_v54, %v1301_v49  ;;  %v2027_v57 = vpop.f32.mrb[9].mxu0  ;;  %v2109_v58 = vpop.f32.mrb[9].mxu1 }
 0x34b   :  { %v2837_v59 = vadd.f32 %v2027_v57, %v1297_v50  ;;  %v2839_v60 = vadd.f32 %v2109_v58, %v1305_v51  ;;  %v2029_v61 = vpop.f32.mrb[10].mxu0  ;;  %v2111_v62 = vpop.f32.mrb[10].mxu1 }
 0x34c   :  { %3300 = vtanh.f32 %v2836_v55  ;;  %v2030_v63 = vpop.f32.mrb[11].mxu0  ;;  %v2112_v47 = vpop.f32.mrb[11].mxu1 }
 0x34d   :  { %3302 = vtanh.f32 %v2838_v56 }
 0x34e   :  { %3304 = vtanh.f32 %v2837_v59 }
 0x34f   :  { %3306 = vtanh.f32 %v2839_v60 }
 0x356   :  { %v3301_v11 = vpop.eup %3300 }
 0x357   :  { %v3303_v13 = vpop.eup %3302  ;;  %v2118_v1 = vpack.c.bf16 %v3301_v11, %v3301_v11 }
 0x358   :  { %v3305_v18 = vpop.eup %3304  ;;  %v2120_v52 = vpack.c.bf16 %v3303_v13, %v3303_v13 }
 0x359   :  { %v3307_v14 = vpop.eup %3306  ;;  %v2119_v0 = vpack.c.bf16 %v3305_v18, %v3305_v18 }
 0x35a   :  { %v2121_v2 = vpack.c.bf16 %v3307_v14, %v3307_v14 }
 0x35b   :  { %2414 = vmatprep.mubr.bf16.mxu0 %v2119_v0 }
 0x35c   :  { %2454 = vmatprep.mubr.bf16.mxu1 %v2121_v2  ;;  %2415 = vmatmul.mubr.bf16.vlgmr.msra.gmra.mrb[12].mxu0 %v2118_v1 }
 0x35d   :  { %2455 = vmatmul.mubr.bf16.vlgmr.msra.gmra.mrb[12].mxu1 %v2120_v52 }
 0x42f   :  { %v2804_v3 = vpop.f32.mrb[12].mxu0 }
 0x430   :  { %v2826_v4 = vpop.f32.mrb[12].mxu1  ;;  %v2805_v6 = vpop.f32.mrb[13].mxu0 }
 0x431   :  { %v2806_v7 = vadd.f32 %v2805_v6, %v2804_v3  ;;  %v2827_v8 = vpop.f32.mrb[13].mxu1  ;;  %v2807_v9 = vpop.f32.mrb[14].mxu0 }
 0x432   :  { %v2828_v15 = vadd.f32 %v2827_v8, %v2826_v4  ;;  %v2829_v16 = vpop.f32.mrb[14].mxu1  ;;  %v2808_v17 = vpop.f32.mrb[15].mxu0 }
 0x433   :  { %v2417_v19 = vadd.f32 %v2806_v7, %v2755_v5  ;;  %v2830_v20 = vpop.f32.mrb[15].mxu1 }
 0x435   :  { %v2457_v21 = vadd.f32 %v2828_v15, %v2417_v19 }
 0x437   :  { %v2463_v22 = vsel %vm2462_vm1, %v2457_v21, -inf }
 0x438   :  { %2464 = vmax.xlane.f32.xlu0 %v2463_v22 }
 0x4c5   :  { %v2465_v24 = vpop.xlane.xlu0 %2464 }
 0x4c6   :  { %v2466_v25 = vsub.f32 %v2457_v21, %v2465_v24 }
 0x4c8   :  { %v2467_v26 = vmul.f32 1.442695, %v2466_v25 }
 0x4ca   :  { %3308 = vpow2.f32 %v2467_v26 }
 0x4d4   :  { %v3309_v27 = vpop.eup %3308 }
 0x4d5   :  { %v2469_v10 = vsel %vm2462_vm1, %v3309_v27, 0.0 }
 0x4d6   :  { %2470 = vadd.xlane.f32.xlu0 %v2469_v10 }
 0x563   :  { %v2471_v28 = vpop.xlane.xlu0 %2470 }
 0x564   :  { %3310 = vrcp.f32 %v2471_v28 }
 0x56e   :  { %v3311_v29 = vpop.eup %3310 }
 0x56f   :  { %v2473_v30 = vmul.f32 %v3311_v29, %v3309_v27 }
 0x571   :  { %2474 = vst.msk [vmem:[#allocation7] sm:$0xff] %vm2462_vm1, %v2473_v30 }
 0x572   :  { %3367 = shalt.err (!%p3364_p6)
}
 0x573   :  { %s3368_s23 = scalar_lea.hbm %s3637_s6, 128 }
 0x574   :  { %p3369_p7 = scmp.ne.s32.totalorder %s3637_s6, %s3368_s23  ;;  %p3372_p8 = scmp.lt.u32.totalorder %s3368_s23, %s3637_s6 }
 0x576   :  { %p3374_p9 = pnand %p3372_p8, %p3369_p7 }
 0x578   :  { %3377 = shalt.err (!%p3374_p9)
}
 0x579   :  { %2484 = dma.vmem_to_hbm [thread:$0]  %s2482_s20, 128, %s3637_s6, [#allocation4]  }
 0x57a   :  { %3382 = dma.done.wait [#allocation4], 128  }
 0x57b   :  { %3383 = vsyncadd [#allocation4], 4294967168 }
 0x57c   :  { %2488 = vsyncpa [#allocation3], 1 }
 0x57d   :  { %2489 = vsyncpa [#allocation6], 1 }
 0x57e   :  { %2490 = vsyncpa [#allocation4], 1 }

</bundles_post_ra>
